<compile_context>
chip_gen: v7x
topology: tpu7x:2x2x1
jax: 0.10.0
libtpu: 0.0.40
codegen_flags: <defaults>
</compile_context>

<pallas_src>
import jax
import jax.numpy as jnp
from jax.experimental import pallas as pl
from jax.experimental.pallas import tpu as pltpu

EPS = 1e-3      # BatchNorm2d(eps=0.001)
TILE_N = 384    # Cout tile, multiple of 128; 1920 / 384 = 5 grid steps


def conv1x1_bn_kernel(x_ref, w_ref, gamma_ref, beta_ref, o_ref):
    """One Cout-tile of fused 1x1-conv (matmul) + train-mode BatchNorm.

    x_ref:     (P, Cin)      f32, resident across all grid steps
    w_ref:     (Cin, TILE_N) bf16 weight tile (pipelined over the grid)
    gamma_ref: (1, TILE_N)   f32 BN scale
    beta_ref:  (1, TILE_N)   f32 BN shift
    o_ref:     (P, TILE_N)   f32 output tile
    """
    # 1x1 conv == matmul on the MXU, f32 accumulation.
    y = jnp.dot(x_ref[...], w_ref[...].astype(jnp.float32),
                preferred_element_type=jnp.float32)

    # Per-channel (per-column) batch stats over all P = N*H*W pixels.
    # One-pass form: biased var = E[y^2] - E[y]^2 (matches PyTorch train BN).
    p = y.shape[0]
    inv_p = 1.0 / p
    mean = jnp.sum(y, axis=0, keepdims=True) * inv_p
    mean_sq = jnp.sum(y * y, axis=0, keepdims=True) * inv_p
    var = mean_sq - mean * mean
    inv_std = jax.lax.rsqrt(var + EPS)          # EUP rsqrt (free slot)

    # Fold BN affine into a single per-channel scale/shift FMA over y.
    scale = inv_std * gamma_ref[...]
    shift = beta_ref[...] - mean * scale
    o_ref[...] = (y * scale + shift).astype(o_ref.dtype)


def conv_bn_forward(x_nchw, w_oihw, gamma, beta, *, tile_n=TILE_N):
    """x_nchw: (N, Cin, H, W); w_oihw: (Cout, Cin, 1, 1); gamma/beta: (Cout,)."""
    n, cin, h, w = x_nchw.shape
    cout = w_oihw.shape[0]
    p = n * h * w

    # NCHW -> (P, Cin)
    x_flat = jnp.transpose(x_nchw, (0, 2, 3, 1)).reshape(p, cin).astype(jnp.float32)
    # (Cout, Cin, 1, 1) -> (Cin, Cout)
    w_mat = jnp.transpose(w_oihw.reshape(cout, cin), (1, 0)).astype(jnp.float32)

    # Pad Cout to a multiple of tile_n (lane-dense, unmasked stores).
    cout_pad = ((cout + tile_n - 1) // tile_n) * tile_n
    pad = cout_pad - cout
    w_mat = jnp.pad(w_mat, ((0, 0), (0, pad)))                       # zeros
    gamma_p = jnp.pad(gamma.astype(jnp.float32), (0, pad),
                      constant_values=1.0).reshape(1, cout_pad)      # ones
    beta_p = jnp.pad(beta.astype(jnp.float32), (0, pad),
                     constant_values=0.0).reshape(1, cout_pad)       # zeros

    # bf16 weights: halves the dominant HBM weight DMA; f32 MXU accumulation.
    w_mat = w_mat.astype(jnp.bfloat16)

    num_tiles = cout_pad // tile_n

    out_flat = pl.pallas_call(
        conv1x1_bn_kernel,
        out_shape=jax.ShapeDtypeStruct((p, cout_pad), jnp.float32),
        grid_spec=pltpu.PrefetchScalarGridSpec(
            num_scalar_prefetch=0,
            grid=(num_tiles,),
            in_specs=[
                pl.BlockSpec((p, cin), lambda i: (0, 0)),       # x resident
                pl.BlockSpec((cin, tile_n), lambda i: (0, i)),  # weight tile
                pl.BlockSpec((1, tile_n), lambda i: (0, i)),    # gamma tile
                pl.BlockSpec((1, tile_n), lambda i: (0, i)),    # beta tile
            ],
            out_specs=pl.BlockSpec((p, tile_n), lambda i: (0, i)),
        ),
        compiler_params=pltpu.CompilerParams(
            dimension_semantics=("parallel",),   # tiles independent; megacore-friendly
            vmem_limit_bytes=16 << 20,
        ),
    )(x_flat, w_mat, gamma_p, beta_p)

    # Drop padded channels; (P, Cout) -> NCHW.
    out_flat = out_flat[:, :cout]
    return jnp.transpose(out_flat.reshape(n, h, w, cout), (0, 3, 1, 2))


def reference_forward(x_nchw, w_oihw, gamma, beta):
    """Pure-JAX reference of the module forward (conv1x1 + train-mode BN), f32."""
    n, cin, h, w = x_nchw.shape
    cout = w_oihw.shape[0]
    x_flat = jnp.transpose(x_nchw, (0, 2, 3, 1)).reshape(-1, cin)
    w_mat = jnp.transpose(w_oihw.reshape(cout, cin))
    y = jnp.dot(x_flat, w_mat, precision=jax.lax.Precision.HIGHEST)
    mean = jnp.mean(y, axis=0, keepdims=True)
    var = jnp.mean((y - mean) ** 2, axis=0, keepdims=True)   # biased
    ynorm = (y - mean) / jnp.sqrt(var + EPS) * gamma[None, :] + beta[None, :]
    return jnp.transpose(ynorm.reshape(n, h, w, cout), (0, 3, 1, 2))


if __name__ == "__main__":
    # Shapes from the PyTorch module: x606 = randn([1, 304, 7, 7]),
    # Conv2d(304, 1824, 1x1, bias=False), BatchNorm2d(1824, eps=1e-3).
    N, CIN, H, W = 1, 304, 7, 7
    COUT = 1824

    key = jax.random.PRNGKey(0)
    kx, kw = jax.random.split(key, 2)

    x = jax.random.normal(kx, (N, CIN, H, W), dtype=jnp.float32)
    # Deterministic "kaiming-like" conv weight init (no checkpoint load).
    w = jax.random.normal(kw, (COUT, CIN, 1, 1), dtype=jnp.float32) * (1.0 / jnp.sqrt(CIN))
    # PyTorch BatchNorm2d default affine init: weight=1, bias=0.
    gamma = jnp.ones((COUT,), dtype=jnp.float32)
    beta = jnp.zeros((COUT,), dtype=jnp.float32)

    out = conv_bn_forward(x, w, gamma, beta)
    out = jax.block_until_ready(out)
    assert out.shape == (N, COUT, H, W), out.shape

    # Tight check: same bf16-quantized weights fed to the f32 reference
    # (isolates kernel structure / BN math from the deliberate weight cast).
    w_q = w.astype(jnp.bfloat16).astype(jnp.float32)
    ref_q = reference_forward(x, w_q, gamma, beta)
    err_q = float(jnp.max(jnp.abs(out - ref_q)))
    assert jnp.allclose(out, ref_q, atol=2e-3, rtol=2e-3), err_q

    # Loose check against the exact f32 module semantics (bf16 weight
    # quantization noise only; BN normalization absorbs most of it).
    ref = reference_forward(x, w, gamma, beta)
    err = float(jnp.max(jnp.abs(out - ref)))
    assert jnp.allclose(out, ref, atol=2e-2, rtol=2e-2), err

    print("KERNEL_OK")
</pallas_src>

<mosaic_0001>
module attributes {stable_mosaic.version = 11 : i64} {
  func.func @conv1x1_bn_kernel(%arg0: i32, %arg1: memref<49x304xf32, #tpu.memory_space<vmem>>, %arg2: memref<304x384xbf16, #tpu.memory_space<vmem>>, %arg3: memref<1x384xf32, #tpu.memory_space<vmem>>, %arg4: memref<1x384xf32, #tpu.memory_space<vmem>>, %arg5: memref<49x384xf32, #tpu.memory_space<vmem>>) attributes {dimension_semantics = [#tpu.dimension_semantics<parallel>], iteration_bounds = array<i64: 5>, scalar_prefetch = 0 : i64, scratch_operands = 0 : i64, tpu.core_type = #tpu.core_type<tc>, window_params = [{pipeline_mode = #tpu.pipeline_mode<synchronous>, transform_indices = @transform_0, window_bounds = array<i64: 49, 304>}, {transform_indices = @transform_1, window_bounds = array<i64: 304, 384>}, {transform_indices = @transform_2, window_bounds = array<i64: 1, 384>}, {transform_indices = @transform_3, window_bounds = array<i64: 1, 384>}, {transform_indices = @transform_4, window_bounds = array<i64: 49, 384>}]} {
    %c0 = arith.constant 0 : index
    %c0_0 = arith.constant 0 : index
    %0 = vector.load %arg1[%c0, %c0_0] : memref<49x304xf32, #tpu.memory_space<vmem>>, vector<49x304xf32>
    %c0_1 = arith.constant 0 : index
    %c0_2 = arith.constant 0 : index
    %1 = vector.load %arg2[%c0_1, %c0_2] : memref<304x384xbf16, #tpu.memory_space<vmem>>, vector<304x384xbf16>
    %2 = arith.extf %1 : vector<304x384xbf16> to vector<304x384xf32>
    %cst = arith.constant dense<0.000000e+00> : vector<49x384xf32>
    %3 = tpu.matmul %0, %2, %cst {dimension_numbers = #tpu.dot_dimension_numbers<[1], [0], [0], [1], [0, 0, 1, 1], [], []>} : vector<49x304xf32>, vector<304x384xf32>, vector<49x384xf32> -> vector<49x384xf32>
    %cst_3 = arith.constant dense<0.000000e+00> : vector<384xf32>
    %4 = vector.multi_reduction <add>, %3, %cst_3 [0] : vector<49x384xf32> to vector<384xf32>
    %5 = vector.shape_cast %4 : vector<384xf32> to vector<1x384xf32>
    %cst_4 = arith.constant 0.0204081628 : f32
    %6 = vector.broadcast %cst_4 : f32 to vector<1x384xf32>
    %7 = arith.mulf %5, %6 : vector<1x384xf32>
    %8 = arith.mulf %3, %3 : vector<49x384xf32>
    %cst_5 = arith.constant dense<0.000000e+00> : vector<384xf32>
    %9 = vector.multi_reduction <add>, %8, %cst_5 [0] : vector<49x384xf32> to vector<384xf32>
    %10 = vector.shape_cast %9 : vector<384xf32> to vector<1x384xf32>
    %cst_6 = arith.constant 0.0204081628 : f32
    %11 = vector.broadcast %cst_6 : f32 to vector<1x384xf32>
    %12 = arith.mulf %10, %11 : vector<1x384xf32>
    %13 = arith.mulf %7, %7 : vector<1x384xf32>
    %14 = arith.subf %12, %13 : vector<1x384xf32>
    %cst_7 = arith.constant 1.000000e-03 : f32
    %15 = vector.broadcast %cst_7 : f32 to vector<1x384xf32>
    %16 = arith.addf %14, %15 : vector<1x384xf32>
    %17 = math.rsqrt %16 : vector<1x384xf32>
    %c0_8 = arith.constant 0 : index
    %c0_9 = arith.constant 0 : index
    %18 = vector.load %arg3[%c0_8, %c0_9] : memref<1x384xf32, #tpu.memory_space<vmem>>, vector<1x384xf32>
    %19 = arith.mulf %17, %18 : vector<1x384xf32>
    %c0_10 = arith.constant 0 : index
    %c0_11 = arith.constant 0 : index
    %20 = vector.load %arg4[%c0_10, %c0_11] : memref<1x384xf32, #tpu.memory_space<vmem>>, vector<1x384xf32>
    %21 = arith.mulf %7, %19 : vector<1x384xf32>
    %22 = arith.subf %20, %21 : vector<1x384xf32>
    %23 = vector.broadcast %19 : vector<1x384xf32> to vector<49x384xf32>
    %24 = arith.mulf %3, %23 : vector<49x384xf32>
    %25 = vector.broadcast %22 : vector<1x384xf32> to vector<49x384xf32>
    %26 = arith.addf %24, %25 : vector<49x384xf32>
    %c0_12 = arith.constant 0 : index
    %c0_13 = arith.constant 0 : index
    %27 = vector.load %arg5[%c0_12, %c0_13] : memref<49x384xf32, #tpu.memory_space<vmem>>, vector<49x384xf32>
    tpu.vector_store %arg5[%c0_12, %c0_13], %26 {strides = array<i32>} : memref<49x384xf32, #tpu.memory_space<vmem>>, vector<49x384xf32>,
    return
  }
  func.func @transform_0(%arg0: i32) -> (i32, i32) {
    %c0_i32 = arith.constant 0 : i32
    %c0_i32_0 = arith.constant 0 : i32
    %c0_i32_1 = arith.constant 0 : i32
    return %c0_i32, %c0_i32_0 : i32, i32
  }
  func.func @transform_1(%arg0: i32) -> (i32, i32) {
    %c0_i32 = arith.constant 0 : i32
    %c0_i32_0 = arith.constant 0 : i32
    return %c0_i32, %arg0 : i32, i32
  }
  func.func @transform_2(%arg0: i32) -> (i32, i32) {
    %c0_i32 = arith.constant 0 : i32
    %c0_i32_0 = arith.constant 0 : i32
    return %c0_i32, %arg0 : i32, i32
  }
  func.func @transform_3(%arg0: i32) -> (i32, i32) {
    %c0_i32 = arith.constant 0 : i32
    %c0_i32_0 = arith.constant 0 : i32
    return %c0_i32, %arg0 : i32, i32
  }
  func.func @transform_4(%arg0: i32) -> (i32, i32) {
    %c0_i32 = arith.constant 0 : i32
    %c0_i32_0 = arith.constant 0 : i32
    return %c0_i32, %arg0 : i32, i32
  }
}

</mosaic_0001>

<bundles_post_ra>
// kernel: tpu_custom_call.1
= control target key start
LH: loop header
LB: loop body
LE: loop exit
PB: predicated region body
PF: predicated region fallthrough
CT: control target
= control target key end

     0   :  { %s2676_s0 = inlined_call_operand.hbm [shape: f32[49,304], index: 0, kind: input, shape index: {}]   ;;  %s2677_s1 = inlined_call_operand.hbm [shape: bf16[304,1920], index: 1, kind: input, shape index: {}]   ;;  %s2678_s2 = inlined_call_operand.hbm [shape: f32[1,1920], index: 2, kind: input, shape index: {}]   ;;  %s2679_s3 = inlined_call_operand.hbm [shape: f32[1,1920], index: 3, kind: input, shape index: {}]   ;;  %s2680_s4 = inlined_call_operand.hbm [shape: f32[49,1920], index: 4, kind: output, shape index: {}]  }
   0x1   :  { %2695 = sst [smem:[#allocation20_spill]] %s2677_s1 }
   0x2   :  { %9 = vsyncpa [#allocation3], 0 }
   0x3   :  { %10 = vsyncpa [#allocation6], 0 }
   0x4   :  { %12 = vsyncpa [#allocation6 + $0x1], 0 }
   0x5   :  { %13 = vsyncpa [#allocation9], 0 }
   0x6   :  { %15 = vsyncpa [#allocation9 + $0x1], 0 }
   0x7   :  { %16 = vsyncpa [#allocation4], 0 }
   0x8   :  { %18 = vsyncpa [#allocation4 + $0x1], 0  ;;  %s2084_s15 = smov 0   ;;  %s2086_s16 = smov 0  }
   0x9   :  { %s2088_s17 = smov 0   ;;  %s2090_s18 = smov 0  }
   0xa LB: > { %2696 = sst [smem:[#allocation15_spill]] %s2028_s15  ;;  %s2105_s19 = sadd.s32 1, %s2040_s18   ;;  %s2040_s18 = sphi %s2090_s18, %s2721_s18   ;;  %s2036_s17 = sphi %s2088_s17, %s2723_s17   ;;  %s2032_s16 = sphi %s2086_s16, %s2725_s16   ;;  %s2028_s15 = sphi %s2084_s15, %s2724_s15  }
   0xb   : > { %2697 = sst [smem:[#allocation16_spill]] %s2036_s17  ;;  %s52_s20 = sadd.s32 1, %s2036_s17 }
   0xc   : > { %2698 = sst [smem:[#allocation17_spill]] %s2105_s19  ;;  %s49_s21 = ssub.s32 %s2040_s18, %s2105_s19 }
   0xd   : > { %p2681_p0 = scmp.ne.s32.totalorder %s2036_s17, %s2032_s16  ;;  %p50_p1 = scmp.eq.s32.totalorder %s49_s21, 0 }
   0xe   : > { %p60_p2 = scmp.eq.s32.totalorder %s2040_s18, 0  ;;  %p1718_p3 = scmp.lt.s32.totalorder %s2040_s18, 5 }
   0xf   : > { %s2115_s22 = scalar_select %p50_p1, %s2036_s17, %s52_s20  }
  0x10   : > { %p61_p4 = por %p60_p2, %p2681_p0  ;;  %s180_s23 = sand.u32 1, %s2040_s18  }
  0x11   : > { %2699 = sst [smem:[#allocation18_spill]] %s2115_s22  ;;  %s2122_s24 = sand.u32 1, %s2036_s17  }
  0x12   : > { %s1681_s25 = smul.u32 456, %s2122_s24  ;;  %p2125_p5 = pnand %p1718_p3, %p61_p4 }
  0x13   : > { %s1384_s27 = smul.u32 192, %s2040_s18  ;;  %s2701_s1 = sld [smem:[#allocation20_spill]] }
  0x14   : > { %s2700_s26 = scalar_select %p2125_p5, 1, 0 }
  0x15   : > { %s184_s5 = scalar_lea.vmem [#allocation5], %s1681_s25  ;;  %s2137_s7 = scalar_lea.sflag [#allocation6], %s180_s23 }
  0x16   : > { %s191_s6 = sshll.u32 %s184_s5, 4  ;;  %p2143_p7 = pneg %p2125_p5  ;;  %s2135_s6 = int_to_ptr.vmem [resolvable:$true] %s191_s6 }
  0x18   : > { %s2702_s9 = scalar_select %p2143_p7, 1, 0 }
  0x19   : > { %s2133_s30 = scalar_lea.hbm %s2701_s1, %s1384_s27  ;;  %s1853_s12 = scalar_lea.hbm %s2701_s1, 36480 }
  0x1a   : > { %s1848_s8 = scalar_lea.hbm %s2133_s30, 7296  ;;  %p1854_p10 = scmp.lt.u32.totalorder %s2133_s30, %s2701_s1 }
  0x1b   : > { %p1849_p6 = scmp.ne.s32.totalorder %s2133_s30, %s1848_s8  ;;  %p1855_p11 = scmp.lt.u32.totalorder %s1853_s12, %s1848_s8 }
  0x1c   : > { %p1857_p13 = scmp.lt.u32.totalorder %s1848_s8, %s2133_s30 }
  0x1d   : > { %p1851_p8 = pnand %p2143_p7, %p1849_p6  ;;  %p1856_p12 = por %p1855_p11, %p1854_p10 }
  0x1f   : > { %p1852_p9 = pneg %p1851_p8  ;;  %p1858_p1 = por %p1857_p13, %p1856_p12 }
  0x21   : > { %p1859_p2 = pnand %p1858_p1, %p1852_p9 }
  0x23   : > { %1862 = shalt.err (!%p1859_p2)
}
  0x24   : > { %s1863_s20 = scalar_lea.vmem %s2135_s6, 7296  ;;  %s2042_s21 = smov [#allocation5]  }
  0x25   : > { %p1864_p3 = scmp.ne.s32.totalorder %s2135_s6, %s1863_s20  ;;  %s1868_s23 = sshll.u32 %s2042_s21, 4  ;;  %s1869_s23 = int_to_ptr.vmem [resolvable:$false] %s1868_s23 }
  0x26   : > { %s1870_s25 = scalar_lea.vmem %s1869_s23, 14592  ;;  %p1871_p8 = scmp.lt.s32.totalorder %s2135_s6, %s1869_s23 }
  0x27   : > { %p1866_p4 = pnand %p1864_p3, %p2143_p7  ;;  %p1872_p0 = scmp.lt.s32.totalorder %s1870_s25, %s1863_s20 }
  0x29   : > { %p1867_p6 = pneg %p1866_p4  ;;  %p1873_p10 = por %p1872_p0, %p1871_p8 }
  0x2b   : > { %p1874_p11 = pnand %p1873_p10, %p1867_p6 }
  0x2d   : > { %1877 = shalt.err (!%p1874_p11)
}
  0x2e   : > { %s2043_s27 = smov 960   ;;  %s2044_s28 = smov 192  }
  0x2f   : > { %s2045_s29 = smov 12   ;;  %s2168_s5 = sadd.s32 4294967295, %s2040_s18  }
  0x30   : > { %1706 = dma.hbm_to_vmem [thread:$0]  (!%p2125_p5), %s2133_s30, 7296, %s2135_s6, %s2137_s7, %s2043_s27, %s2044_s28, %s2045_s29  }
  0x31   : > { %s1358_s8 = sadd.s32 4294967294, %s2040_s18   ;;  %p65_p0 = scmp.ne.s32.totalorder %s2032_s16, %s2028_s15 }
  0x32   : > { %p2683_p9 = scmp.eq.s32.totalorder %s2168_s5, 0  ;;  %p141_p12 = scmp.eq.s32.totalorder %s2168_s5, 4 }
  0x33   : > { %p147_p13 = scmp.eq.s32.totalorder %s1358_s8, 4  ;;  %p1359_p1 = scmp.ge.s32.totalorder %s2040_s18, 1 }
  0x34   : > { %p2178_p2 = por %p2683_p9, %p65_p0  ;;  %p2704_p3 = scmp.ne.s32.totalorder %s2036_s17, %s2032_s16 }
  0x35   : > { %p2189_p6 = por %p147_p13, %p65_p0  ;;  %p154_p8 = scmp.lt.s32.totalorder %s2040_s18, 6 }
  0x36   : > { %s2703_s10 = scalar_select %p2178_p2, 1, 0 }
  0x37   : > { %p2185_p4 = por %p141_p12, %p2704_p3  ;;  %p2194_p10 = pnand %p1359_p1, %p154_p8 }
  0x38   : > { %s2706_s6 = scalar_select %p2189_p6, 1, 0 }
  0x39   : > { %s2705_s30 = scalar_select %p2185_p4, 1, 0 }
  0x3a   : > { %2707 = sst [smem:[#allocation19_spill]] %s2706_s6  ;;  %s2046_s12 = smov [#allocation2]  }
  0x3b   : > { %s2708_s11 = scalar_select %p2194_p10, 1, 0 }
  0x3c   : > { %s166_s13 = sshll.u32 %s2046_s12, 4  ;;  %p1699_p11 = pneg %p2194_p10  ;;  %s167_s13 = int_to_ptr.vmem [resolvable:$true] %s166_s13 }
  0x3d   : > { %s1682_s14 = smul.u32 3, %s2122_s24  ;;  %s1878_s8 = scalar_lea.hbm %s2676_s0, 2688 }
  0x3e   : > { %p2203_p12 = pnand %p1699_p11, %p2683_p9  ;;  %s1385_s21 = smul.u32 48, %s2040_s18 }
  0x3f   : > { %p1879_p0 = scmp.ne.s32.totalorder %s2676_s0, %s1878_s8  ;;  %p1885_p8 = scmp.lt.u32.totalorder %s1878_s8, %s2676_s0 }
  0x40   : > { %s2211_s27 = scalar_lea.hbm %s2678_s2, %s1385_s21  ;;  %p1880_p13 = pneg %p2203_p12 }
  0x42   : > { %p1881_p1 = pnand %p1880_p13, %p1879_p0 }
  0x44   : > { %p1882_p3 = pneg %p1881_p1 }
  0x46   : > { %p1887_p11 = pnand %p1885_p8, %p1882_p3 }
  0x48   : > { %1890 = shalt.err (!%p1887_p11)
}
  0x49   : > { %s1891_s23 = scalar_lea.vmem %s167_s13, 2688  ;;  %p1899_p2 = scmp.lt.s32.totalorder %s167_s13, %s167_s13 }
  0x4a   : > { %p1892_p9 = scmp.ne.s32.totalorder %s167_s13, %s1891_s23  ;;  %p1900_p10 = scmp.lt.s32.totalorder %s1891_s23, %s1891_s23 }
  0x4c   : > { %p1894_p6 = pnand %p1892_p9, %p1880_p13  ;;  %p1901_p5 = por %p1900_p10, %p1899_p2 }
  0x4e   : > { %p1895_p4 = pneg %p1894_p6 }
  0x50   : > { %p1902_p7 = pnand %p1901_p5, %p1895_p4 }
  0x52   : > { %1905 = shalt.err (!%p1902_p7)
}
  0x53   : > { %s2047_s1 = smov 384   ;;  %s2048_s25 = smov 24  }
  0x54   : > { %1702 = dma.hbm_to_vmem [thread:$0]  (!%p2203_p12), %s2676_s0, 2688, %s167_s13, [#allocation3], %s2047_s1, %s2047_s1, %s2048_s25  }
  0x55   : > { %s205_s28 = scalar_lea.vmem [#allocation7], %s1682_s14  ;;  %s2232_s23 = scalar_lea.hbm %s2679_s3, %s1385_s21 }
  0x56   : > { %s213_s29 = sshll.u32 %s205_s28, 4  ;;  %s2236_s19 = scalar_lea.vmem [#allocation8], %s1682_s14  ;;  %s2234_s29 = int_to_ptr.vmem [resolvable:$true] %s213_s29 }
  0x57   : > { %s232_s6 = sshll.u32 %s2236_s19, 4  ;;  %s1906_s15 = scalar_lea.hbm %s2211_s27, 48  ;;  %s233_s6 = int_to_ptr.vmem [resolvable:$true] %s232_s6 }
  0x58   : > { %p1907_p5 = scmp.ne.s32.totalorder %s2211_s27, %s1906_s15  ;;  %p2710_p7 = scmp.ne.s32.totalorder %s2702_s9, 0 }
  0x59   : > { %s1911_s1 = scalar_lea.hbm %s2678_s2, 240  ;;  %p1912_p4 = scmp.lt.u32.totalorder %s2211_s27, %s2678_s2 }
  0x5a   : > { %p1909_p9 = pnand %p1907_p5, %p2710_p7  ;;  %p1913_p6 = scmp.lt.u32.totalorder %s1911_s1, %s1906_s15 }
  0x5b   : > { %p1915_p12 = scmp.lt.u32.totalorder %s1906_s15, %s2211_s27 }
  0x5c   : > { %p1910_p2 = pneg %p1909_p9  ;;  %p1914_p10 = por %p1913_p6, %p1912_p4 }
  0x5e   : > { %p1916_p0 = por %p1915_p12, %p1914_p10 }
  0x60   : > { %p1917_p13 = pnand %p1916_p0, %p1910_p2 }
  0x62   : > { %1920 = shalt.err (!%p1917_p13)
}
  0x63   : > { %s1921_s19 = scalar_lea.vmem %s2234_s29, 48  ;;  %s2049_s14 = smov [#allocation7]  }
  0x64   : > { %p1922_p1 = scmp.ne.s32.totalorder %s2234_s29, %s1921_s19  ;;  %s1926_s21 = sshll.u32 %s2049_s14, 4  ;;  %s1927_s21 = int_to_ptr.vmem [resolvable:$false] %s1926_s21 }
  0x65   : > { %s1928_s22 = scalar_lea.vmem %s1927_s21, 96  ;;  %p1929_p11 = scmp.lt.s32.totalorder %s2234_s29, %s1927_s21 }
  0x66   : > { %p1924_p3 = pnand %p1922_p1, %p2710_p7  ;;  %p1930_p5 = scmp.lt.s32.totalorder %s1928_s22, %s1921_s19 }
  0x68   : > { %p1925_p8 = pneg %p1924_p3  ;;  %p1931_p9 = por %p1930_p5, %p1929_p11 }
  0x6a   : > { %p1932_p4 = pnand %p1931_p9, %p1925_p8 }
  0x6c   : > { %1935 = shalt.err (!%p1932_p4)
}
  0x6d   : > { %p2711_p2 = scmp.ne.s32.totalorder %s2700_s26, 0  ;;  %s221_s15 = scalar_lea.sflag [#allocation9], %s2122_s24 }
  0x6e   : > { %s1936_s28 = scalar_lea.hbm %s2232_s23, 48  ;;  %s1941_s20 = scalar_lea.hbm %s2679_s3, 240 }
  0x6f   : > { %1709 = dma.hbm_to_vmem [thread:$0]  (!%p2711_p2), %s2211_s27, 48, %s2234_s29, %s2137_s7  }
  0x70   : > { %p1937_p6 = scmp.ne.s32.totalorder %s2232_s23, %s1936_s28  ;;  %p1942_p0 = scmp.lt.u32.totalorder %s2232_s23, %s2679_s3 }
  0x71   : > { %p1943_p13 = scmp.lt.u32.totalorder %s1941_s20, %s1936_s28  ;;  %p1945_p3 = scmp.lt.u32.totalorder %s1936_s28, %s2232_s23 }
  0x72   : > { %p1939_p10 = pnand %p1937_p6, %p2710_p7 }
  0x73   : > { %p1944_p1 = por %p1943_p13, %p1942_p0 }
  0x74   : > { %p1940_p12 = pneg %p1939_p10 }
  0x75   : > { %p1946_p8 = por %p1945_p3, %p1944_p1 }
  0x77   : > { %p1947_p11 = pnand %p1946_p8, %p1940_p12 }
  0x79   : > { %1950 = shalt.err (!%p1947_p11)
}
  0x7a   : > { %s1951_s24 = scalar_lea.vmem %s233_s6, 48  ;;  %s2050_s7 = smov [#allocation8]  }
  0x7b   : > { %p1952_p5 = scmp.ne.s32.totalorder %s233_s6, %s1951_s24  ;;  %s1956_s27 = sshll.u32 %s2050_s7, 4  ;;  %s1957_s27 = int_to_ptr.vmem [resolvable:$false] %s1956_s27 }
  0x7c   : > { %s1958_s29 = scalar_lea.vmem %s1957_s27, 96  ;;  %p1959_p6 = scmp.lt.s32.totalorder %s233_s6, %s1957_s27 }
  0x7d   : > { %p1954_p9 = pnand %p1952_p5, %p2710_p7  ;;  %p1960_p10 = scmp.lt.s32.totalorder %s1958_s29, %s1951_s24 }
  0x7f   : > { %p1955_p4 = pneg %p1954_p9  ;;  %p1961_p2 = por %p1960_p10, %p1959_p6 }
  0x81   : > { %p1962_p0 = pnand %p1961_p2, %p1955_p4 }
  0x83   : > { %1965 = shalt.err (!%p1962_p0)
}
  0x84   : > { %p2712_p13 = scmp.ne.s32.totalorder %s2700_s26, 0  ;;  %p2713_p12 = scmp.ne.s32.totalorder %s2708_s11, 0 }
  0x85   : > { %p2714_p1 = scmp.eq.s32.totalorder (!%p2713_p12), %s2168_s5, 0 }
  0x86   : > { %1712 = dma.hbm_to_vmem [thread:$0]  (!%p2712_p13), %s2232_s23, 48, %s233_s6, %s221_s15  }
  0x87   : > { %241 = sbr.rel (%p2713_p12) target bundleno = 544 (0x220), region = 36 }
  0x8e   : > { %2011 = dma.done.wait (%p2714_p1), [#allocation3], 2688   ;;  %p2715_p7 = pmov %p2714_p1 }
  0x8f   : > { %s247_s9 = sand.u32 1, %s2168_s5   ;;  %s2287_s25 = sand.u32 1, %s2032_s16  }
  0x90   : > { %2013 = vsyncadd (%p2715_p7), [#allocation3], 4294964608  ;;  %s1684_s17 = smul.u32 456, %s2287_s25  ;;  %s248_s26 = scalar_lea.sflag [#allocation6], %s247_s9 }
  0x91   : > { %p2716_p2 = scmp.ne.s32.totalorder %s2703_s10, 0 }
  0x92   : > { %s2290_s19 = scalar_lea.vmem [#allocation5], %s1684_s17 }
  0x93   : > { %2015 = dma.done.wait (%p2716_p2), %s248_s26, 7344  }
  0x94   : > { %2017 = vsyncadd (%p2716_p2), %s248_s26, 4294959952  ;;  %s1685_s6 = smul.u32 3, %s2287_s25  ;;  %s266_s23 = scalar_lea.sflag [#allocation9], %s2287_s25 }
  0x96   : > { %s2297_s11 = scalar_lea.vmem [#allocation7], %s1685_s6  ;;  %s2300_s14 = scalar_lea.vmem [#allocation8], %s1685_s6 }
  0x97   : > { %2019 = dma.done.wait (%p2716_p2), %s266_s23, 48  }
  0x98   : > { %2021 = vsyncadd (%p2716_p2), %s266_s23, 4294967248  ;;  %v2051_v0 = vmov 0.0   ;;  %v1766_v1 = vld [vmem:[%s2290_s19 + $0x4] ss:$12 sps:$4 sm:$0xff]   ;;  %v1770_v3 = vld [vmem:[%s2290_s19] ss:$12 sps:$4 sm:$0xff]  }
  0x99   : > { %712 = vmatprep.mubr.f32.mxu1 %v2051_v0  ;;  %v1768_v2 = vld [vmem:[%s2290_s19 + $0x184] ss:$12 sps:$4 sm:$0xff]   ;;  %1488 = vmatprep.subr.bf16.mxu0 %v1766_v1  ;;  %v1771_v4 = vld [vmem:[%s2290_s19 + $0x180] ss:$12 sps:$4 sm:$0xff]   ;;  %v1772_v5 = vld [vmem:[%s2290_s19 + $0x1c] ss:$12 sps:$4 sm:$0xff]  }
  0x9a   : > { %1552 = vmatprep.subr.bf16.mxu1 %v1768_v2  ;;  %1490 = vmatpush1.bf16.msra.mxu0 %v1770_v3  ;;  %v1774_v6 = vld [vmem:[%s2290_s19 + $0x19c] ss:$12 sps:$4 sm:$0xff]   ;;  %v1776_v7 = vld [vmem:[%s2290_s19 + $0x18] ss:$12 sps:$4 sm:$0xff]   ;;  %v1778_v9 = vld [vmem:[%s2290_s19 + $0x34] ss:$12 sps:$4 sm:$0xff]  }
  0x9b   : > { %1554 = vmatpush1.bf16.msra.mxu1 %v1771_v4  ;;  %1492 = vmatprep.subr.bf16.mxu0 %v1772_v5  ;;  %v1777_v8 = vld [vmem:[%s2290_s19 + $0x198] ss:$12 sps:$4 sm:$0xff]   ;;  %v1780_v10 = vld [vmem:[%s2290_s19 + $0x1b4] ss:$12 sps:$4 sm:$0xff]   ;;  %v1782_v11 = vld [vmem:[%s2290_s19 + $0x30] ss:$12 sps:$4 sm:$0xff]  }
  0x9c   : > { %1556 = vmatprep.subr.bf16.mxu1 %v1774_v6  ;;  %v1783_v12 = vld [vmem:[%s2290_s19 + $0x1b0] ss:$12 sps:$4 sm:$0xff]   ;;  %v1784_v13 = vld [vmem:[%s2290_s19 + $0x4c] ss:$12 sps:$4 sm:$0xff]   ;;  %v1786_v14 = vld [vmem:[%s2290_s19 + $0xc8] ss:$12 sps:$4 sm:$0xff]  }
  0x9d   : > { %v1787_v15 = vld [vmem:[%s2290_s19 + $0x48] ss:$12 sps:$4 sm:$0xff]   ;;  %vm519_vm0 = vcmask 392192   ;;  %v1789_v18 = vld [vmem:[%s2290_s19 + $0x64] ss:$12 sps:$4 sm:$0xff]   ;;  %v2052_v58 = vmov 0.0|0.0  }
  0x9e   : > { %1494 = vmatpush1.bf16.msra.mxu0 %v1776_v7  ;;  %v2322_v16 = vld [vmem:[#allocation2 + $0x10] sm:$0xff]  ;;  %v2331_v22 = vld [vmem:[#allocation2 + $0x28] sm:$0xff]  ;;  %v2341_v28 = vld [vmem:[#allocation2 + $0x40] sm:$0xff]  ;;  %vm2053_vm1 = vmmov 0   ;;  %vm960_vm2 = vcmask 1040384   ;;  %s1686_s10 = smul.u32 168, %s2287_s25 }
  0x9f   : > { %1558 = vmatpush1.bf16.msra.mxu1 %v1777_v8  ;;  %1496 = vmatprep.subr.bf16.mxu0 %v1778_v9  ;;  %v1788_v17 = vld [vmem:[%s2290_s19 + $0x8] ss:$12 sps:$4 sm:$0xff]   ;;  %v1791_v19 = vld [vmem:[%s2290_s19 + $0xe0] ss:$12 sps:$4 sm:$0xff]   ;;  %v1796_v24 = vld [vmem:[%s2290_s19 + $0xf8] ss:$12 sps:$4 sm:$0xff]  }
  0xa0   : > { %1560 = vmatprep.subr.bf16.mxu1 %v1780_v10  ;;  %v1792_v20 = vld [vmem:[%s2290_s19 + $0x60] ss:$12 sps:$4 sm:$0xff]   ;;  %v1794_v23 = vld [vmem:[%s2290_s19 + $0x7c] ss:$12 sps:$4 sm:$0xff]   ;;  %v1797_v25 = vld [vmem:[%s2290_s19 + $0x78] ss:$12 sps:$4 sm:$0xff]  }
  0xa1   : > { %v1793_v21 = vld [vmem:[%s2290_s19 + $0x20] ss:$12 sps:$4 sm:$0xff]   ;;  %v1798_v26 = vld [vmem:[%s2290_s19 + $0x38] ss:$12 sps:$4 sm:$0xff]   ;;  %v1801_v29 = vld [vmem:[%s2290_s19 + $0x110] ss:$12 sps:$4 sm:$0xff]  }
  0xa2   : > { %1498 = vmatpush1.bf16.msra.mxu0 %v1782_v11  ;;  %v1799_v27 = vld [vmem:[%s2290_s19 + $0x94] ss:$12 sps:$4 sm:$0xff]   ;;  %v1802_v30 = vld [vmem:[%s2290_s19 + $0x90] ss:$12 sps:$4 sm:$0xff]   ;;  %v1804_v32 = vld [vmem:[%s2290_s19 + $0xac] ss:$12 sps:$4 sm:$0xff]  }
  0xa3   : > { %1562 = vmatpush1.bf16.msra.mxu1 %v1783_v12  ;;  %1500 = vmatprep.subr.bf16.mxu0 %v1784_v13  ;;  %v1803_v31 = vld [vmem:[%s2290_s19 + $0x50] ss:$12 sps:$4 sm:$0xff]   ;;  %v1806_v34 = vld [vmem:[%s2290_s19 + $0x128] ss:$12 sps:$4 sm:$0xff]   ;;  %v1811_v39 = vld [vmem:[%s2290_s19 + $0x140] ss:$12 sps:$4 sm:$0xff]  }
  0xa4   : > { %1564 = vmatprep.subr.bf16.mxu1 %v1786_v14  ;;  %v2350_v33 = vld [vmem:[#allocation2 + $0x58] sm:$0xff]  ;;  %v2359_v38 = vld [vmem:[#allocation2 + $0x70] sm:$0xff]  ;;  %v2368_v43 = vld [vmem:[#allocation2 + $0x88] sm:$0xff]  ;;  %s1387_s21 = smul.u32 384, %s2168_s5  ;;  %s2603_s22 = scalar_lea.vmem [#allocation10], %s1686_s10 }
  0xa5   : > { %v1807_v35 = vld [vmem:[%s2290_s19 + $0xa8] ss:$12 sps:$4 sm:$0xff]   ;;  %v1809_v37 = vld [vmem:[%s2290_s19 + $0xc4] ss:$12 sps:$4 sm:$0xff]   ;;  %v1812_v40 = vld [vmem:[%s2290_s19 + $0xc0] ss:$12 sps:$4 sm:$0xff]  }
  0xa6   : > { %1367 = vmatmul.mubr.msk.f32.vlgmr.msra.gmra.mrb[0].mxu1 %vm519_vm0, %v2322_v16  ;;  %1502 = vmatpush1.bf16.msra.mxu0 %v1787_v15  ;;  %v1808_v36 = vld [vmem:[%s2290_s19 + $0x68] ss:$12 sps:$4 sm:$0xff]   ;;  %v1813_v41 = vld [vmem:[%s2290_s19 + $0x80] ss:$12 sps:$4 sm:$0xff]   ;;  %v1816_v44 = vld [vmem:[%s2290_s19 + $0x158] ss:$12 sps:$4 sm:$0xff]   ;;  %s2617_s8 = scalar_lea.hbm %s2680_s4, %s1387_s21 }
  0xa7   : > { %1566 = vmatpush3.bf16.msra.mxu1 %v1788_v17  ;;  %1504 = vmatprep.subr.bf16.mxu0 %v1789_v18  ;;  %v1814_v42 = vld [vmem:[%s2290_s19 + $0xdc] ss:$12 sps:$4 sm:$0xff]   ;;  %v1817_v45 = vld [vmem:[%s2290_s19 + $0xd8] ss:$12 sps:$4 sm:$0xff]   ;;  %v1819_v47 = vld [vmem:[%s2290_s19 + $0xf4] ss:$12 sps:$4 sm:$0xff]  }
  0xa8   : > { %1568 = vmatprep.subr.bf16.mxu1 %v1791_v19  ;;  %718 = vmatprep.mubr.f32.mxu1 %v2051_v0  ;;  %v1818_v46 = vld [vmem:[%s2290_s19 + $0x98] ss:$12 sps:$4 sm:$0xff]   ;;  %v1821_v49 = vld [vmem:[%s2290_s19 + $0x170] ss:$12 sps:$4 sm:$0xff]   ;;  %v1826_v55 = vld [vmem:[%s2290_s19 + $0x108] ss:$12 sps:$4 sm:$0xff]  }
  0xa9   : > { %v2377_v48 = vld [vmem:[#allocation2 + $0xa0] sm:$0x1]  ;;  %v309_v50 = vld [vmem:[#allocation2 + $0x8] sm:$0xff]  ;;  %v1833_v59 = vld [vmem:[%s2290_s19 + $0x188] ss:$12 sps:$4 sm:$0xff]   ;;  %s1230_s15 = sshll.u32 %s2603_s22, 4  ;;  %s2624_s15 = int_to_ptr.vmem [resolvable:$true] %s1230_s15 }
  0xaa   : > { %1368 = vmatmul.mubr.msk.f32.gmra.mrb[2].mxu1 %vm519_vm0, %v2331_v22  ;;  %1506 = vmatpush1.bf16.msra.mxu0 %v1792_v20  ;;  %v1822_v51 = vld [vmem:[%s2290_s19 + $0xf0] ss:$12 sps:$4 sm:$0xff]   ;;  %v1824_v53 = vld [vmem:[%s2290_s19 + $0x10c] ss:$12 sps:$4 sm:$0xff]   ;;  %v1834_v5 = vld [vmem:[%s2290_s19 + $0x154] ss:$12 sps:$4 sm:$0xff]  }
  0xab   : > { %1570 = vmatpush3.bf16.msra.mxu1 %v1793_v21  ;;  %1508 = vmatprep.subr.bf16.mxu0 %v1794_v23  ;;  %v1823_v52 = vld [vmem:[%s2290_s19 + $0xb0] ss:$12 sps:$4 sm:$0xff]   ;;  %v1829_v61 = vld [vmem:[%s2290_s19 + $0x120] ss:$12 sps:$4 sm:$0xff]   ;;  %v1832_v3 = vld [vmem:[%s2290_s19 + $0x138] ss:$12 sps:$4 sm:$0xff]  }
  0xac   : > { %1572 = vmatprep.subr.bf16.mxu1 %v1796_v24  ;;  %724 = vmatprep.mubr.f32.mxu1 %v2051_v0  ;;  %v308_v54 = vld [vmem:[#allocation2] sm:$0xff]  ;;  %v311_v60 = vld [vmem:[#allocation2 + $0x18] sm:$0xff]  ;;  %v314_v2 = vld [vmem:[#allocation2 + $0x30] sm:$0xff]  ;;  %s1217_s12 = scalar_lea.sflag [#allocation4], %s2287_s25  ;;  %s1966_s20 = scalar_lea.vmem %s2624_s15, 2688 }
  0xad   : > { %605 = vmatprep.mubr.f32.mxu0 %v309_v50  ;;  %v312_v56 = vld [vmem:[#allocation2 + $0x20] sm:$0xff]  ;;  %v315_v62 = vld [vmem:[#allocation2 + $0x38] sm:$0xff]  ;;  %v318_v4 = vld [vmem:[#allocation2 + $0x50] sm:$0xff]  ;;  %p1967_p3 = scmp.ne.s32.totalorder %s2624_s15, %s1966_s20  ;;  %p2717_p8 = scmp.ne.s32.totalorder %s2705_s30, 0 }
  0xae   : > { %1369 = vmatmul.mubr.msk.f32.gmra.mrb[4].mxu1 %vm519_vm0, %v2341_v28  ;;  %1510 = vmatpush1.bf16.msra.mxu0 %v1797_v25  ;;  %v1827_v57 = vld [vmem:[%s2290_s19 + $0x124] ss:$12 sps:$4 sm:$0xff]   ;;  %v1830_v63 = vld [vmem:[%s2290_s19 + $0x13c] ss:$12 sps:$4 sm:$0xff]   ;;  %v1840_v1 = vld [vmem:[%s2290_s19 + $0x1a0] ss:$12 sps:$4 sm:$0xff]  }
  0xaf   : > { %1574 = vmatpush3.bf16.msra.mxu1 %v1798_v26  ;;  %1512 = vmatprep.subr.bf16.mxu0 %v1799_v27  ;;  %v1841_v6 = vld [vmem:[%s2290_s19 + $0x1b8] ss:$12 sps:$4 sm:$0xff]   ;;  %v1836_v8 = vld [vmem:[%s2290_s19 + $0x150] ss:$12 sps:$4 sm:$0xff]   ;;  %v1839_v12 = vld [vmem:[%s2290_s19 + $0x168] ss:$12 sps:$4 sm:$0xff]   ;;  %p1968_p11 = pnand %p1967_p3, %p2717_p8 }
  0xb0   : > { %1576 = vmatprep.subr.bf16.mxu1 %v1801_v29  ;;  %730 = vmatprep.mubr.f32.mxu1 %v2051_v0  ;;  %v317_v7 = vld [vmem:[#allocation2 + $0x48] sm:$0xff]  ;;  %v320_v11 = vld [vmem:[#allocation2 + $0x60] sm:$0xff]  ;;  %v323_v14 = vld [vmem:[#allocation2 + $0x78] sm:$0xff]  ;;  %s2055_s13 = smov [#allocation10]  }
  0xb1   : > { %v321_v9 = vld [vmem:[#allocation2 + $0x68] sm:$0xff]  ;;  %v324_v13 = vld [vmem:[#allocation2 + $0x80] sm:$0xff]  ;;  %v327_v15 = vld [vmem:[#allocation2 + $0x98] sm:$0x1]  ;;  %p1969_p5 = pneg %p1968_p11  ;;  %s1970_s1 = sshll.u32 %s2055_s13, 4  ;;  %s1971_s1 = int_to_ptr.vmem [resolvable:$false] %s1970_s1 }
  0xb2   : > { %1370 = vmatmul.mubr.msk.f32.gmra.mrb[6].mxu1 %vm519_vm0, %v2350_v33  ;;  %1514 = vmatpush1.bf16.msra.mxu0 %v1802_v30  ;;  %v1837_v10 = vld [vmem:[%s2290_s19 + $0x16c] ss:$12 sps:$4 sm:$0xff]   ;;  %v326_v17 = vld [vmem:[#allocation2 + $0x90] sm:$0x1]  ;;  %s1972_s24 = scalar_lea.vmem %s1971_s1, 5376  ;;  %p1973_p9 = scmp.lt.s32.totalorder %s2624_s15, %s1971_s1 }
  0xb3   : > { %1578 = vmatpush3.bf16.msra.mxu1 %v1803_v31  ;;  %1516 = vmatprep.subr.bf16.mxu0 %v1804_v32  ;;  %p1974_p4 = scmp.lt.s32.totalorder %s1972_s24, %s1966_s20 }
  0xb4   : > { %1580 = vmatprep.subr.bf16.mxu1 %v1806_v34  ;;  %736 = vmatprep.mubr.f32.mxu1 %v2051_v0 }
  0xb5   : > { %p1975_p6 = por %p1974_p4, %p1973_p9 }
  0xb6   : > { %1371 = vmatmul.mubr.msk.f32.gmra.mrb[8].mxu1 %vm519_vm0, %v2359_v38  ;;  %1518 = vmatpush1.bf16.msra.mxu0 %v1807_v35 }
  0xb7   : > { %1582 = vmatpush3.bf16.msra.mxu1 %v1808_v36  ;;  %1520 = vmatprep.subr.bf16.mxu0 %v1809_v37  ;;  %p1976_p10 = pnand %p1975_p6, %p1969_p5 }
  0xb8   : > { %1584 = vmatprep.subr.bf16.mxu1 %v1811_v39  ;;  %742 = vmatprep.mubr.f32.mxu1 %v2051_v0 }
  0xba   : > { %1372 = vmatmul.mubr.msk.f32.gmra.mrb[10].mxu1 %vm519_vm0, %v2368_v43  ;;  %1522 = vmatpush1.bf16.msra.mxu0 %v1812_v40 }
  0xbb   : > { %1586 = vmatpush3.bf16.msra.mxu1 %v1813_v41  ;;  %1524 = vmatprep.subr.bf16.mxu0 %v1814_v42 }
  0xbc   : > { %1588 = vmatprep.subr.bf16.mxu1 %v1816_v44  ;;  %748 = vmatprep.mubr.f32.mxu1 %v2051_v0 }
  0xbe   : > { %1373 = vmatmul.mubr.msk.f32.gmra.mrb[12].mxu1 %vm519_vm0, %v2377_v48  ;;  %1526 = vmatpush1.bf16.msra.mxu0 %v1817_v45 }
  0xbf   : > { %1590 = vmatpush3.bf16.msra.mxu1 %v1818_v46  ;;  %1528 = vmatprep.subr.bf16.mxu0 %v1819_v47 }
  0xc0   : > { %1592 = vmatprep.subr.bf16.mxu1 %v1821_v49  ;;  %819 = vmatprep.mubr.f32.mxu1 %v309_v50 }
  0xc2   : > { %1530 = vmatpush1.bf16.msra.mxu0 %v1822_v51 }
  0xc3   : > { %1594 = vmatpush3.bf16.msra.mxu1 %v1823_v52  ;;  %1532 = vmatprep.subr.bf16.mxu0 %v1824_v53 }
  0xc4   : > { %1604 = vmatprep.subr.bf16.mxu1 %v2052_v58 }
  0xc6   : > { %820 = vmatmul.mubr.f32.vlgmr.msra.gmra.mrb[14].mxu1 %v308_v54  ;;  %1534 = vmatpush1.bf16.msra.mxu0 %v1826_v55 }
  0xc7   : > { %824 = vmatprep.mubr.f32.mxu1 %v312_v56  ;;  %1536 = vmatprep.subr.bf16.mxu0 %v1827_v57 }
  0xc8   : > { %1607 = vmatpush3.bf16.msra.mxu1 %v1833_v59 }
  0xc9   : > { %1605 = vmatprep.subr.bf16.mxu1 %v2052_v58 }
  0xca   : > { %825 = vmatmul.mubr.f32.gmra.mrb[16].mxu1 %v311_v60  ;;  %1538 = vmatpush1.bf16.msra.mxu0 %v1829_v61 }
  0xcb   : > { %829 = vmatprep.mubr.f32.mxu1 %v315_v62  ;;  %1540 = vmatprep.subr.bf16.mxu0 %v1830_v63 }
  0xcc   : > { %1608 = vmatpush3.bf16.msra.mxu1 %v1840_v1 }
  0xcd   : > { %1606 = vmatprep.subr.bf16.mxu1 %v2052_v58 }
  0xce   : > { %830 = vmatmul.mubr.f32.gmra.mrb[18].mxu1 %v314_v2  ;;  %1542 = vmatpush1.bf16.msra.mxu0 %v1832_v3 }
  0xcf   : > { %834 = vmatprep.mubr.f32.mxu1 %v318_v4  ;;  %1544 = vmatprep.subr.bf16.mxu0 %v1834_v5 }
  0xd0   : > { %1609 = vmatpush3.bf16.msra.mxu1 %v1841_v6 }
  0xd2   : > { %835 = vmatmul.mubr.f32.gmra.mrb[20].mxu1 %v317_v7  ;;  %1546 = vmatpush1.bf16.msra.mxu0 %v1836_v8 }
  0xd3   : > { %839 = vmatprep.mubr.f32.mxu1 %v321_v9  ;;  %1548 = vmatprep.subr.bf16.mxu0 %v1837_v10 }
  0xd6   : > { %840 = vmatmul.mubr.f32.gmra.mrb[22].mxu1 %v320_v11  ;;  %1550 = vmatpush1.bf16.msra.mxu0 %v1839_v12 }
  0xd7   : > { %844 = vmatprep.mubr.f32.mxu1 %v324_v13  ;;  %1595 = vmatprep.subr.bf16.mxu0 %v2052_v58 }
  0xd9   : > { %606 = vmatmul.mubr.f32.vlgmr.msra.gmra.mrb[0].mxu0 %v308_v54 }
  0xda   : > { %845 = vmatmul.mubr.f32.gmra.mrb[24].mxu1 %v323_v14  ;;  %1597 = vmatpush3.bf16.msra.mxu0 %v1833_v59 }
  0xdb   : > { %611 = vmatprep.mubr.f32.mxu0 %v312_v56  ;;  %849 = vmatprep.mubr.f32.mxu1 %v327_v15 }
  0xdc   : > { %1598 = vmatprep.subr.bf16.mxu0 %v2052_v58 }
  0xdd   : > { %612 = vmatmul.mubr.f32.gmra.mrb[2].mxu0 %v311_v60 }
  0xde   : > { %850 = vmatmul.mubr.f32.gmra.mrb[26].mxu1 %v326_v17  ;;  %617 = vmatprep.mubr.f32.mxu0 %v315_v62 }
  0xdf   : > { %1469 = vmatprep.mubr.msk.f32.mxu1 %vm2053_vm1, %v2051_v0  ;;  %1600 = vmatpush3.bf16.msra.mxu0 %v1840_v1 }
  0xe0   : > { %1601 = vmatprep.subr.bf16.mxu0 %v2052_v58 }
  0xe1   : > { %618 = vmatmul.mubr.f32.gmra.mrb[4].mxu0 %v314_v2 }
  0xe2   : > { %1470 = vmatmul.mubr.msk.f32.vlgmr.msra.gmra.mrb[28].mxu1 %vm519_vm0, %v2331_v22  ;;  %623 = vmatprep.mubr.f32.mxu0 %v318_v4 }
  0xe3   : > { %1472 = vmatprep.mubr.msk.f32.mxu1 %vm2053_vm1, %v2051_v0  ;;  %1603 = vmatpush3.bf16.msra.mxu0 %v1841_v6 }
  0xe5   : > { %624 = vmatmul.mubr.f32.gmra.mrb[6].mxu0 %v317_v7 }
  0xe6   : > { %1473 = vmatmul.mubr.msk.f32.gmra.mrb[30].mxu1 %vm519_vm0, %v2341_v28  ;;  %629 = vmatprep.mubr.f32.mxu0 %v321_v9 }
  0xe7   : > { %1475 = vmatprep.mubr.msk.f32.mxu1 %vm2053_vm1, %v2051_v0 }
  0xe9   : > { %630 = vmatmul.mubr.f32.gmra.mrb[8].mxu0 %v320_v11 }
  0xea   : > { %1476 = vmatmul.mubr.msk.f32.gmra.mrb[32].mxu1 %vm519_vm0, %v2350_v33  ;;  %635 = vmatprep.mubr.f32.mxu0 %v324_v13 }
  0xeb   : > { %1478 = vmatprep.mubr.msk.f32.mxu1 %vm2053_vm1, %v2051_v0 }
  0xed   : > { %636 = vmatmul.mubr.f32.gmra.mrb[10].mxu0 %v323_v14 }
  0xee   : > { %1479 = vmatmul.mubr.msk.f32.gmra.mrb[34].mxu1 %vm519_vm0, %v2359_v38  ;;  %641 = vmatprep.mubr.f32.mxu0 %v327_v15 }
  0xef   : > { %1481 = vmatprep.mubr.msk.f32.mxu1 %vm2053_vm1, %v2051_v0 }
  0xf1   : > { %642 = vmatmul.mubr.f32.gmra.mrb[12].mxu0 %v326_v17 }
  0xf2   : > { %1482 = vmatmul.mubr.msk.f32.gmra.mrb[36].mxu1 %vm519_vm0, %v2368_v43  ;;  %1466 = vmatprep.mubr.msk.f32.mxu0 %vm2053_vm1, %v2051_v0 }
  0xf3   : > { %1484 = vmatprep.mubr.msk.f32.mxu1 %vm2053_vm1, %v2051_v0 }
  0xf5   : > { %1467 = vmatmul.mubr.msk.f32.vlgmr.msra.gmra.mrb[14].mxu0 %vm519_vm0, %v2322_v16 }
  0xf6   : > { %1485 = vmatmul.mubr.msk.f32.gmra.mrb[38].mxu1 %vm519_vm0, %v2377_v48 }
 0x179   : > { %v714_v18 = vpop.f32.mrb[0].mxu1 }
 0x17a   : > { %v716_v19 = vpop.f32.mrb[1].mxu1 }
 0x17d   : > { %v720_v20 = vpop.f32.mrb[2].mxu1 }
 0x17e   : > { %v722_v21 = vpop.f32.mrb[3].mxu1 }
 0x181   : > { %v726_v22 = vpop.f32.mrb[4].mxu1 }
 0x182   : > { %v728_v23 = vpop.f32.mrb[5].mxu1 }
 0x185   : > { %v732_v24 = vpop.f32.mrb[6].mxu1 }
 0x186   : > { %v2426_v25 = vpop.f32.mrb[7].mxu1 }
 0x189   : > { %v2428_v26 = vpop.f32.mrb[8].mxu1 }
 0x18a   : > { %v2430_v27 = vpop.f32.mrb[9].mxu1 }
 0x18d   : > { %v2432_v0 = vpop.f32.mrb[10].mxu1 }
 0x18e   : > { %v2434_v28 = vpop.f32.mrb[11].mxu1 }
 0x191   : > { %v2436_v16 = vpop.f32.mrb[12].mxu1 }
 0x192   : > { %v2438_v29 = vpop.f32.mrb[13].mxu1 }
 0x199   : > { %v1420_v30 = vpop.f32.mrb[14].mxu1 }
 0x19a   : > { %v1421_v31 = vpop.f32.mrb[15].mxu1 }
 0x19b   : > { %v2440_v32 = vadd.f32 %v1421_v31, %v1420_v30 }
 0x19d   : > { %v1423_v33 = vpop.f32.mrb[16].mxu1 }
 0x19e   : > { %v1424_v34 = vpop.f32.mrb[17].mxu1 }
 0x19f   : > { %v1425_v35 = vadd.f32 %v1424_v34, %v1423_v33 }
 0x1a1   : > { %v1426_v36 = vpop.f32.mrb[18].mxu1 }
 0x1a2   : > { %v1427_v37 = vpop.f32.mrb[19].mxu1 }
 0x1a3   : > { %v1428_v38 = vadd.f32 %v1427_v37, %v1426_v36 }
 0x1a5   : > { %v1429_v39 = vpop.f32.mrb[20].mxu1 }
 0x1a6   : > { %v1430_v40 = vpop.f32.mrb[21].mxu1 }
 0x1a7   : > { %v1431_v41 = vadd.f32 %v1430_v40, %v1429_v39 }
 0x1a9   : > { %v1432_v42 = vpop.f32.mrb[22].mxu1 }
 0x1aa   : > { %v1433_v43 = vpop.f32.mrb[23].mxu1 }
 0x1ab   : > { %v2442_v44 = vadd.f32 %v1433_v43, %v1432_v42 }
 0x1ac   : > { %v607_v45 = vpop.f32.mrb[0].mxu0 }
 0x1ad   : > { %v1435_v46 = vpop.f32.mrb[24].mxu1  ;;  %v2444_v47 = vadd.f32 %v714_v18, %v607_v45  ;;  %v609_v48 = vpop.f32.mrb[1].mxu0 }
 0x1ae   : > { %v1436_v49 = vpop.f32.mrb[25].mxu1  ;;  %v2446_v50 = vadd.f32 %v716_v19, %v609_v48 }
 0x1af   : > { %v2448_v51 = vadd.f32 %v1436_v49, %v1435_v46  ;;  %v998_v59 = vmul.f32 %v2444_v47, %v2444_v47 }
 0x1b0   : > { %v613_v52 = vpop.f32.mrb[2].mxu0  ;;  %v999_v62 = vmul.f32 %v2446_v50, %v2446_v50 }
 0x1b1   : > { %v1438_v53 = vpop.f32.mrb[26].mxu1  ;;  %v2450_v54 = vadd.f32 %v720_v20, %v613_v52  ;;  %v615_v55 = vpop.f32.mrb[3].mxu0 }
 0x1b2   : > { %v1439_v56 = vpop.f32.mrb[27].mxu1  ;;  %v2452_v57 = vadd.f32 %v722_v21, %v615_v55 }
 0x1b3   : > { %v2454_v58 = vadd.f32 %v1439_v56, %v1438_v53  ;;  %v955_v60 = vadd.f32 %v2450_v54, %v2444_v47  ;;  %v1001_v61 = vmul.f32 %v2450_v54, %v2450_v54 }
 0x1b4   : > { %v969_v63 = vadd.f32 %v2452_v57, %v2446_v50  ;;  %v1002_v1 = vmul.f32 %v2452_v57, %v2452_v57  ;;  %v619_v2 = vpop.f32.mrb[4].mxu0 }
 0x1b5   : > { %v926_v3 = vpop.f32.mrb[28].mxu1  ;;  %v1019_v4 = vadd.f32 %v1001_v61, %v998_v59  ;;  %v2468_v5 = vadd.f32 %v726_v22, %v619_v2  ;;  %v621_v7 = vpop.f32.mrb[5].mxu0 }
 0x1b6   : > { %v2470_v6 = vadd.f32 %v1425_v35, %v926_v3  ;;  %v1471_v8 = vpop.f32.mrb[29].mxu1  ;;  %v1032_v9 = vadd.f32 %v1002_v1, %v999_v62  ;;  %v2472_v10 = vadd.f32 %v728_v23, %v621_v7 }
 0x1b7   : > { %v956_v11 = vadd.f32 %v955_v60, %v2468_v5  ;;  %v1004_v12 = vmul.f32 %v2468_v5, %v2468_v5 }
 0x1b8   : > { %v970_v13 = vadd.f32 %v969_v63, %v2472_v10  ;;  %v1005_v14 = vmul.f32 %v2472_v10, %v2472_v10  ;;  %v625_v15 = vpop.f32.mrb[6].mxu0 }
 0x1b9   : > { %v931_v17 = vpop.f32.mrb[30].mxu1  ;;  %v1020_v18 = vadd.f32 %v1019_v4, %v1004_v12  ;;  %v2480_v19 = vadd.f32 %v732_v24, %v625_v15  ;;  %v627_v21 = vpop.f32.mrb[7].mxu0 }
 0x1ba   : > { %v2482_v20 = vadd.f32 %v1428_v38, %v931_v17  ;;  %v1474_v22 = vpop.f32.mrb[31].mxu1  ;;  %v1033_v23 = vadd.f32 %v1032_v9, %v1005_v14  ;;  %v2485_v30 = vadd.f32 %v2426_v25, %v627_v21 }
 0x1bb   : > { %v957_v31 = vadd.f32 %v956_v11, %v2480_v19  ;;  %v1007_v33 = vmul.f32 %v2480_v19, %v2480_v19 }
 0x1bc   : > { %v971_v34 = vadd.f32 %v970_v13, %v2485_v30  ;;  %v1008_v35 = vmul.f32 %v2485_v30, %v2485_v30  ;;  %v631_v24 = vpop.f32.mrb[8].mxu0 }
 0x1bd   : > { %v936_v36 = vpop.f32.mrb[32].mxu1  ;;  %v1021_v37 = vadd.f32 %v1020_v18, %v1007_v33  ;;  %v2494_v38 = vadd.f32 %v2428_v26, %v631_v24  ;;  %v633_v25 = vpop.f32.mrb[9].mxu0 }
 0x1be   : > { %v2496_v39 = vadd.f32 %v1431_v41, %v936_v36  ;;  %v1477_v40 = vpop.f32.mrb[33].mxu1  ;;  %v1034_v42 = vadd.f32 %v1033_v23, %v1008_v35  ;;  %v2499_v43 = vadd.f32 %v2430_v27, %v633_v25 }
 0x1bf   : > { %v958_v45 = vadd.f32 %v957_v31, %v2494_v38  ;;  %v1010_v46 = vmul.f32 %v2494_v38, %v2494_v38  ;;  %v1003_v31 = vmul.f32 %v2470_v6, %v2470_v6 }
 0x1c0   : > { %v972_v48 = vadd.f32 %v971_v34, %v2499_v43  ;;  %v1011_v49 = vmul.f32 %v2499_v43, %v2499_v43  ;;  %v637_v26 = vpop.f32.mrb[10].mxu0 }
 0x1c1   : > { %v941_v52 = vpop.f32.mrb[34].mxu1  ;;  %v1022_v41 = vadd.f32 %v1021_v37, %v1010_v46  ;;  %v2508_v53 = vadd.f32 %v2432_v0, %v637_v26  ;;  %v639_v27 = vpop.f32.mrb[11].mxu0 }
 0x1c2   : > { %v2511_v55 = vadd.f32 %v2442_v44, %v941_v52  ;;  %v1480_v56 = vpop.f32.mrb[35].mxu1  ;;  %v1035_v59 = vadd.f32 %v1034_v42, %v1011_v49  ;;  %v2514_v60 = vadd.f32 %v2434_v28, %v639_v27  ;;  %v1009_v49 = vmul.f32 %v2496_v39, %v2496_v39 }
 0x1c3   : > { %v959_v61 = vadd.f32 %v958_v45, %v2508_v53  ;;  %v1013_v62 = vmul.f32 %v2508_v53, %v2508_v53 }
 0x1c4   : > { %v973_v63 = vadd.f32 %v972_v48, %v2514_v60  ;;  %v1014_v0 = vmul.f32 %v2514_v60, %v2514_v60  ;;  %v643_v1 = vpop.f32.mrb[12].mxu0 }
 0x1c5   : > { %v946_v44 = vpop.f32.mrb[36].mxu1  ;;  %v1023_v2 = vadd.f32 %v1022_v41, %v1013_v62  ;;  %v2523_v3 = vadd.f32 %v2436_v16, %v643_v1  ;;  %v645_v4 = vpop.f32.mrb[13].mxu0 }
 0x1c6   : > { %v2526_v28 = vadd.f32 %v2448_v51, %v946_v44  ;;  %v1483_v7 = vpop.f32.mrb[37].mxu1  ;;  %v1036_v8 = vadd.f32 %v1035_v59, %v1014_v0  ;;  %v2529_v9 = vadd.f32 %v2438_v29, %v645_v4 }
 0x1c7   : > { %v961_v11 = vsel %vm960_vm2, %v2523_v3, 0.0  ;;  %v1016_v12 = vmul.f32 %v2523_v3, %v2523_v3 }
 0x1c8   : > { %v962_v13 = vadd.f32 %v961_v11, %v959_v61  ;;  %v974_v16 = vsel %vm960_vm2, %v2529_v9, 0.0  ;;  %v1017_v51 = vmul.f32 %v2529_v9, %v2529_v9  ;;  %v921_v14 = vpop.f32.mrb[14].mxu0  ;;  %v1012_v61 = vmul.f32 %v2511_v55, %v2511_v55 }
 0x1c9   : > { %v951_v15 = vpop.f32.mrb[38].mxu1  ;;  %v1024_v17 = vsel %vm960_vm2, %v1016_v12, 0.0  ;;  %v975_v18 = vadd.f32 %v974_v16, %v973_v63  ;;  %v2541_v29 = vadd.f32 %v2440_v32, %v921_v14  ;;  %v1468_v22 = vpop.f32.mrb[15].mxu0 }
 0x1ca   : > { %v2544_v21 = vadd.f32 %v2454_v58, %v951_v15  ;;  %v1486_v23 = vpop.f32.mrb[39].mxu1  ;;  %v963_v33 = vrot.slane %v962_v13, 4  ;;  %v1025_v34 = vadd.f32 %v1024_v17, %v1023_v2  ;;  %v1037_v35 = vsel %vm960_vm2, %v1017_v51, 0.0 }
 0x1cb   : > { %v976_v24 = vrot.slane %v975_v18, 4  ;;  %v1038_v36 = vadd.f32 %v1037_v35, %v1036_v8  ;;  %v982_v37 = vadd.f32 %v2470_v6, %v2541_v29  ;;  %v1000_v32 = vmul.f32 %v2541_v29, %v2541_v29 }
 0x1cc   : > { %v1006_v58 = vmul.f32 %v2482_v20, %v2482_v20  ;;  %v964_v25 = vadd.f32 %v963_v33, %v962_v13  ;;  %v1026_v40 = vrot.slane %v1025_v34, 4  ;;  %v1015_v8 = vmul.f32 %v2526_v28, %v2526_v28 }
 0x1cd   : > { %v977_v42 = vadd.f32 %v976_v24, %v975_v18  ;;  %v1039_v45 = vrot.slane %v1038_v36, 4  ;;  %v983_v46 = vadd.f32 %v982_v37, %v2482_v20  ;;  %v1045_v48 = vadd.f32 %v1003_v31, %v1000_v32 }
 0x1ce   : > { %v965_v26 = vrot.slane %v964_v25, 2  ;;  %v1027_v52 = vadd.f32 %v1026_v40, %v1025_v34  ;;  %v1018_v11 = vmul.f32 %v2544_v21, %v2544_v21  ;;  %v987_v17 = vsel %vm960_vm2, %v2544_v21, 0.0 }
 0x1cf   : > { %v978_v41 = vrot.slane %v977_v42, 2  ;;  %v1040_v27 = vadd.f32 %v1039_v45, %v1038_v36  ;;  %v984_v56 = vadd.f32 %v983_v46, %v2496_v39  ;;  %v1046_v59 = vadd.f32 %v1045_v48, %v1006_v58 }
 0x1d0   : > { %v966_v62 = vadd.f32 %v965_v26, %v964_v25  ;;  %v1028_v63 = vrot.slane %v1027_v52, 2  ;;  %v1050_v35 = vsel %vm960_vm2, %v1018_v11, 0.0  ;;  %v1075_v40 = vlaneseq }
 0x1d1   : > { %v979_v0 = vadd.f32 %v978_v41, %v977_v42  ;;  %v1041_v1 = vrot.slane %v1040_v27, 2  ;;  %v1047_v44 = vadd.f32 %v1046_v59, %v1009_v49  ;;  %v985_v2 = vadd.f32 %v984_v56, %v2511_v55 }
 0x1d2   : > { %v967_v4 = vrot.slane %v966_v62, 1  ;;  %v1029_v7 = vadd.f32 %v1028_v63, %v1027_v52  ;;  %v2570_v56 = vshrl.u32 %v1075_v40, 7 }
 0x1d3   : > { %v980_v12 = vrot.slane %v979_v0, 1  ;;  %v1042_v13 = vadd.f32 %v1041_v1, %v1040_v27  ;;  %v986_v16 = vadd.f32 %v985_v2, %v2526_v28  ;;  %v1048_v51 = vadd.f32 %v1047_v44, %v1012_v61 }
 0x1d4   : > { %v968_v14 = vadd.f32 %v967_v4, %v966_v62  ;;  %v1030_v15 = vrot.slane %v1029_v7, 1  ;;  %v1077_v1 = vsub.s32 0, %v2570_v56  ;;  %v1073_v4 = vld [vmem:[%s2297_s11] sm:$0x7] }
 0x1d5   : > { %v981_v18 = vadd.f32 %v980_v12, %v979_v0  ;;  %v1043_v22 = vrot.slane %v1042_v13, 1  ;;  %v988_v23 = vadd.f32 %v987_v17, %v986_v16  ;;  %v1049_v31 = vadd.f32 %v1048_v51, %v1015_v8 }
 0x1d6   : > { %v995_v33 = vmul.f32 0.020408163, %v968_v14  ;;  %v1031_v34 = vadd.f32 %v1030_v15, %v1029_v7  ;;  %v1081_v7 = vsub.s32 1, %v2570_v56  ;;  %v1078_v12 = vrot.slane %v1073_v4, %v1077_v1 }
 0x1d7   : > { %v996_v24 = vmul.f32 0.020408163, %v981_v18  ;;  %v1044_v36 = vadd.f32 %v1043_v22, %v1042_v13  ;;  %v989_v37 = vrot.slane %v988_v23, 4  ;;  %v1051_v32 = vadd.f32 %v1050_v35, %v1049_v31 }
 0x1d8   : > { %v1058_v58 = vmul.f32 0.020408163, %v1031_v34  ;;  %v1061_v25 = vmul.f32 %v995_v33, %v995_v33  ;;  %v1082_v51 = vrot.slane %v1073_v4, %v1081_v7 }
 0x1d9   : > { %v1059_v42 = vmul.f32 0.020408163, %v1044_v36  ;;  %v1062_v45 = vmul.f32 %v996_v24, %v996_v24  ;;  %v990_v46 = vadd.f32 %v989_v37, %v988_v23  ;;  %v1052_v48 = vrot.slane %v1051_v32, 4 }
 0x1da   : > { %v1064_v49 = vsub.f32 %v1058_v58, %v1061_v25  ;;  %v2054_v36 = vmov 1966171168   ;;  %v1085_v58 = vsub.s32 2, %v2570_v56 }
 0x1db   : > { %v1065_v26 = vsub.f32 %v1059_v42, %v1062_v45  ;;  %v991_v52 = vrot.slane %v990_v46, 2  ;;  %v1053_v41 = vadd.f32 %v1052_v48, %v1051_v32  ;;  %v1102_v37 = vunpack.c.l.s4 %v2054_v36 }
 0x1dc   : > { %v1067_v27 = vadd.f32 0.001, %v1064_v49 }
 0x1dd   : > { %v1068_v59 = vadd.f32 0.001, %v1065_v26  ;;  %v992_v61 = vadd.f32 %v991_v52, %v990_v46  ;;  %v1054_v62 = vrot.slane %v1053_v41, 2  ;;  %v1103_v52 = vunpack.c.0.s8 %v1102_v37 }
 0x1de   : > { %1842 = vrsqrt.f32 %v1067_v27 }
 0x1df   : > { %1844 = vrsqrt.f32 %v1068_v59  ;;  %v993_v63 = vrot.slane %v992_v61, 1  ;;  %v1055_v0 = vadd.f32 %v1054_v62, %v1053_v41  ;;  %v1106_v41 = vsub.s32 %v1103_v52, %v2570_v56 }
 0x1e1   : > { %v994_v44 = vadd.f32 %v993_v63, %v992_v61  ;;  %v1056_v2 = vrot.slane %v1055_v0, 1 }
 0x1e3   : > { %v997_v8 = vmul.f32 0.020408163, %v994_v44  ;;  %v1057_v11 = vadd.f32 %v1056_v2, %v1055_v0  ;;  %v1093_v0 = vld [vmem:[%s2300_s14] sm:$0x7] }
 0x1e5   : > { %v1060_v13 = vmul.f32 0.020408163, %v1057_v11  ;;  %v1063_v16 = vmul.f32 %v997_v8, %v997_v8 }
 0x1e7   : > { %v1066_v14 = vsub.f32 %v1060_v13, %v1063_v16 }
 0x1e8   : > { %v1843_v15 = vpop.eup %1842 }
 0x1e9   : > { %v1845_v17 = vpop.eup %1844  ;;  %v1090_v18 = vmul.f32 %v1843_v15, %v1078_v12  ;;  %v1069_v22 = vadd.f32 0.001, %v1066_v14 }
 0x1ea   : > { %v1091_v23 = vmul.f32 %v1845_v17, %v1082_v51 }
 0x1eb   : > { %v1094_v31 = vmul.f32 %v1090_v18, %v995_v33  ;;  %v1128_v34 = vrot.slane %v1090_v18, %v1077_v1  ;;  %1846 = vrsqrt.f32 %v1069_v22 }
 0x1ec   : > { %v1095_v35 = vmul.f32 %v1091_v23, %v996_v24  ;;  %v1132_v32 = vrot.slane %v1091_v23, %v1077_v1 }
 0x1ed   : > { %v1137_v25 = vmul.f32 %v1128_v34, %v2444_v47  ;;  %v1140_v40 = vmul.f32 %v1128_v34, %v2450_v54  ;;  %v1143_v42 = vmul.f32 %v1128_v34, %v2468_v5  ;;  %v1146_v45 = vmul.f32 %v1128_v34, %v2480_v19 }
 0x1ee   : > { %v1149_v46 = vmul.f32 %v1128_v34, %v2494_v38  ;;  %v1152_v33 = vmul.f32 %v1128_v34, %v2508_v53  ;;  %v2583_v48 = vmul.f32 %v1128_v34, %v2523_v3  ;;  %v1100_v24 = vcombine.low %v1094_v31, %v1095_v35 }
 0x1ef   : > { %v1138_v49 = vmul.f32 %v1132_v32, %v2446_v50  ;;  %v1141_v26 = vmul.f32 %v1132_v32, %v2452_v57  ;;  %v1144_v47 = vmul.f32 %v1132_v32, %v2472_v10  ;;  %v1147_v54 = vmul.f32 %v1132_v32, %v2485_v30 }
 0x1f0   : > { %v1150_v5 = vmul.f32 %v1132_v32, %v2499_v43  ;;  %v1153_v19 = vmul.f32 %v1132_v32, %v2514_v60  ;;  %v1156_v38 = vmul.f32 %v1132_v32, %v2529_v9  ;;  %v1086_v53 = vrot.slane %v1073_v4, %v1085_v58 }
 0x1f1   : > { %v1107_v59 = vrot.slane %v1100_v24, %v1106_v41 }
 0x1f5   : > { %v1847_v3 = vpop.eup %1846 }
 0x1f6   : > { %v1092_v50 = vmul.f32 %v1847_v3, %v1086_v53 }
 0x1f8   : > { %v1096_v27 = vmul.f32 %v1092_v50, %v997_v8  ;;  %v1136_v57 = vrot.slane %v1092_v50, %v1077_v1 }
 0x1fa   : > { %v1114_v10 = vrot.slane %v1096_v27, %v1106_v41  ;;  %v1139_v30 = vmul.f32 %v1136_v57, %v2541_v29  ;;  %v1142_v43 = vmul.f32 %v1136_v57, %v2470_v6  ;;  %v1145_v60 = vmul.f32 %v1136_v57, %v2482_v20 }
 0x1fb   : > { %v1148_v9 = vmul.f32 %v1136_v57, %v2496_v39  ;;  %v1151_v61 = vmul.f32 %v1136_v57, %v2511_v55  ;;  %v1154_v62 = vmul.f32 %v1136_v57, %v2526_v28  ;;  %v1157_v56 = vmul.f32 %v1136_v57, %v2544_v21 }
 0x1fc   : > { %v1115_v63 = vcombine.low %v1107_v59, %v1114_v10 }
 0x1fe   : > { %v1122_v44 = vrot.slane %v1115_v63, %v1106_v41 }
 0x200   : > { %v1124_v2 = vsub.f32 %v1093_v0, %v1122_v44 }
 0x202   : > { %v1162_v4 = vrot.slane %v1124_v2, %v1077_v1  ;;  %v1166_v8 = vrot.slane %v1124_v2, %v1081_v7  ;;  %v1170_v29 = vrot.slane %v1124_v2, %v1085_v58 }
 0x204   : > { %v1174_v6 = vadd.f32 %v1162_v4, %v1137_v25  ;;  %v1175_v11 = vadd.f32 %v1166_v8, %v1138_v49  ;;  %v1176_v20 = vadd.f32 %v1170_v29, %v1139_v30  ;;  %v1177_v12 = vadd.f32 %v1162_v4, %v1140_v40 }
 0x205   : > { %v1178_v39 = vadd.f32 %v1166_v8, %v1141_v26  ;;  %v1179_v13 = vadd.f32 %v1170_v29, %v1142_v43  ;;  %v1180_v55 = vadd.f32 %v1162_v4, %v1143_v42  ;;  %v1181_v16 = vadd.f32 %v1166_v8, %v1144_v47 }
 0x206   : > { %v1182_v28 = vadd.f32 %v1170_v29, %v1145_v60  ;;  %v1183_v21 = vadd.f32 %v1162_v4, %v1146_v45  ;;  %v1184_v1 = vadd.f32 %v1166_v8, %v1147_v54  ;;  %v1185_v7 = vadd.f32 %v1170_v29, %v1148_v9  ;;  %1195 = vst [vmem:[%s2603_s22] sm:$0xff] %v1174_v6 }
 0x207   : > { %1196 = vst [vmem:[%s2603_s22 + $0x8] sm:$0xff] %v1175_v11  ;;  %1197 = vst [vmem:[%s2603_s22 + $0x10] sm:$0xff] %v1176_v20  ;;  %v1186_v51 = vadd.f32 %v1162_v4, %v1149_v46  ;;  %v1187_v14 = vadd.f32 %v1166_v8, %v1150_v5  ;;  %v1188_v15 = vadd.f32 %v1170_v29, %v1151_v61 }
 0x208   : > { %1198 = vst [vmem:[%s2603_s22 + $0x18] sm:$0xff] %v1177_v12  ;;  %v1189_v17 = vadd.f32 %v1162_v4, %v1152_v33  ;;  %1199 = vst [vmem:[%s2603_s22 + $0x20] sm:$0xff] %v1178_v39  ;;  %v1190_v18 = vadd.f32 %v1166_v8, %v1153_v19  ;;  %v1191_v22 = vadd.f32 %v1170_v29, %v1154_v62 }
 0x209   : > { %1200 = vst [vmem:[%s2603_s22 + $0x28] sm:$0xff] %v1179_v13  ;;  %1201 = vst [vmem:[%s2603_s22 + $0x30] sm:$0xff] %v1180_v55  ;;  %v1192_v23 = vadd.f32 %v1162_v4, %v2583_v48  ;;  %v1193_v31 = vadd.f32 %v1166_v8, %v1156_v38  ;;  %v1194_v34 = vadd.f32 %v1170_v29, %v1157_v56 }
 0x20a   : > { %1202 = vst [vmem:[%s2603_s22 + $0x38] sm:$0xff] %v1181_v16  ;;  %1203 = vst [vmem:[%s2603_s22 + $0x40] sm:$0xff] %v1182_v28 }
 0x20b   : > { %1204 = vst [vmem:[%s2603_s22 + $0x48] sm:$0xff] %v1183_v21  ;;  %1205 = vst [vmem:[%s2603_s22 + $0x50] sm:$0xff] %v1184_v1 }
 0x20c   : > { %1206 = vst [vmem:[%s2603_s22 + $0x58] sm:$0xff] %v1185_v7  ;;  %1207 = vst [vmem:[%s2603_s22 + $0x60] sm:$0xff] %v1186_v51 }
 0x20d   : > { %1208 = vst [vmem:[%s2603_s22 + $0x68] sm:$0xff] %v1187_v14  ;;  %1209 = vst [vmem:[%s2603_s22 + $0x70] sm:$0xff] %v1188_v15 }
 0x20e   : > { %1210 = vst [vmem:[%s2603_s22 + $0x78] sm:$0xff] %v1189_v17  ;;  %1211 = vst [vmem:[%s2603_s22 + $0x80] sm:$0xff] %v1190_v18 }
 0x20f   : > { %1212 = vst [vmem:[%s2603_s22 + $0x88] sm:$0xff] %v1191_v22  ;;  %1213 = vst [vmem:[%s2603_s22 + $0x90] sm:$0x1] %v1192_v23 }
 0x210   : > { %1214 = vst [vmem:[%s2603_s22 + $0x98] sm:$0x1] %v1193_v31  ;;  %1215 = vst [vmem:[%s2603_s22 + $0xa0] sm:$0x1] %v1194_v34 }
 0x211   : > { %1979 = shalt.err (!%p1976_p10)
}
 0x212   : > { %s1980_s7 = scalar_lea.hbm %s2617_s8, 2688  ;;  %s1984_s9 = scalar_lea.hbm %s2680_s4, 13440 }
 0x213   : > { %p1981_p0 = scmp.ne.s32.totalorder %s2617_s8, %s1980_s7  ;;  %p1985_p1 = scmp.lt.u32.totalorder %s2617_s8, %s2680_s4 }
 0x214   : > { %p1986_p7 = scmp.lt.u32.totalorder %s1984_s9, %s1980_s7  ;;  %p1988_p3 = scmp.lt.u32.totalorder %s1980_s7, %s2617_s8 }
 0x215   : > { %p1982_p13 = pnand %p1981_p0, %p2717_p8 }
 0x216   : > { %p1987_p2 = por %p1986_p7, %p1985_p1 }
 0x217   : > { %p1983_p12 = pneg %p1982_p13 }
 0x218   : > { %p1989_p11 = por %p1988_p3, %p1987_p2 }
 0x21a   : > { %p1990_p5 = pnand %p1989_p11, %p1983_p12 }
 0x21c   : > { %1993 = shalt.err (!%p1990_p5)
}
 0x21d   : > { %s2056_s19 = smov 384   ;;  %s2057_s6 = smov 1920  }
 0x21e   : > { %s2058_s11 = smov 24  }
 0x21f   : > { %1697 = dma.vmem_to_hbm [thread:$0]  (%p2717_p8), %s2624_s15, 2688, %s2617_s8, %s1217_s12, %s2056_s19, %s2057_s6, %s2058_s11  }
 0x220 PF: > { %s2718_s23 = sld [smem:[#allocation15_spill]]  ;;  %s2719_s14 = sld [smem:[#allocation19_spill]] }
 0x221   : > { %p1720_p9 = scmp.ge.s32.totalorder %s2040_s18, 2 }
 0x226   : > { %s1245_s10 = sand.u32 1, %s2718_s23   ;;  %p2720_p4 = scmp.ne.s32.totalorder %s2719_s14, 0 }
 0x227   : > { %s1246_s21 = scalar_lea.sflag [#allocation4], %s1245_s10 }
 0x228   : > { %p1714_p6 = pnand %p1720_p9, %p2720_p4 }
 0x22a   : > { %2023 = dma.done.wait (!%p1714_p6), %s1246_s21, 2688  }
 0x22b   : > { %2025 = vsyncadd (!%p1714_p6), %s1246_s21, 4294964608  ;;  %s2721_s18 = sld [smem:[#allocation17_spill]]  ;;  %s2722_s22 = sld [smem:[#allocation16_spill]] }
 0x22c   : > { %s2723_s17 = sld [smem:[#allocation18_spill]]  ;;  %s2724_s15 = smov %s2032_s16 }
 0x231   : > { %p21_p10 = scmp.ge.s32.totalorder %s2721_s18, 7   ;;  %s2725_s16 = smov %s2722_s22 }
 0x233   :  { %23 = sbr.rel (!%p21_p10) target bundleno = 10 (0xa), region = 110 }
 0x23a   :  { %1251 = vsyncpa [#allocation3], 1 }
 0x23b   :  { %1253 = vsyncpa [#allocation3 + $0x1], 1 }
 0x23c   :  { %1254 = vsyncpa [#allocation6], 1 }
 0x23d   :  { %1256 = vsyncpa [#allocation6 + $0x1], 1 }
 0x23e   :  { %1257 = vsyncpa [#allocation9], 1 }
 0x23f   :  { %1259 = vsyncpa [#allocation9 + $0x1], 1 }
 0x240   :  { %1260 = vsyncpa [#allocation4], 1 }
 0x241   :  { %1262 = vsyncpa [#allocation4 + $0x1], 1 }

</bundles_post_ra>
